<compile_context>
chip_gen: v6e
topology: v6e:2x2x1
jax: 0.10.0
libtpu: 0.0.40
codegen_flags: <defaults>
</compile_context>

<pallas_src>
import functools

import jax
import jax.numpy as jnp
from jax import lax
from jax.experimental import pallas as pl
from jax.experimental.pallas import tpu as pltpu  # noqa: F401  (TPU backend)


def _unicl_kernel(txt_ref, img_ref, lab_ref, out_ref, *, logit_scale: float):
    txt = txt_ref[...].astype(jnp.float32)      # (N, D)
    img = img_ref[...].astype(jnp.float32)      # (N, D)
    n = txt.shape[0]

    # --- F.normalize(x, dim=-1): x / max(||x||, eps) == x * rsqrt(max(||x||^2, eps^2))
    eps2 = 1e-24  # (1e-12)^2

    def inv_norm(x):
        ssq = jnp.sum(x * x, axis=-1, keepdims=True)        # (N, 1)
        return lax.rsqrt(jnp.maximum(ssq, eps2))            # EUP rsqrt, no divide

    # Fold logit_scale into the image operand's per-row inverse norm.
    img_s = img * (inv_norm(img) * logit_scale)              # (N, D) scaled + normalized
    txt_n = txt * inv_norm(txt)                               # (N, D) normalized

    # --- single MXU matmul: logits == logits_per_image ; logits_per_text == logits.T
    logits = lax.dot_general(
        img_s, txt_n, (((1,), (1,)), ((), ())),
        preferred_element_type=jnp.float32)                   # (N, N)

    # --- target matrix (symmetric) ---
    lab_row = lab_ref[...].astype(jnp.int32)                  # (1, N)
    lab_col = jnp.transpose(lab_row)                          # (N, 1) via tiny XLU op
    lab_j = jnp.broadcast_to(lab_row, (n, n))                 # labels[j] along lanes
    lab_i = jnp.broadcast_to(lab_col, (n, n))                 # labels[i] along sublanes
    eye = (lax.broadcasted_iota(jnp.int32, (n, n), 0)
           == lax.broadcasted_iota(jnp.int32, (n, n), 1))
    same = (lab_i == lab_j) & (lab_i != -1) & (lab_j != -1)
    tgt = jnp.where(eye | same, 1.0, 0.0).astype(jnp.float32)  # (N, N)

    # --- SoftCE(s, t) = mean_i [ -(t_i . log_softmax(s_i)) / sum_j t_ij ] ---
    # Row-wise on `logits`  == SoftCE(logits_per_image, tgt).
    # Column-wise on `logits` == SoftCE(logits_per_text, tgt)  (tgt symmetric).
    def log_softmax(s, axis):
        m = jnp.max(s, axis=axis, keepdims=True)
        lse = m + jnp.log(jnp.sum(jnp.exp(s - m), axis=axis, keepdims=True))
        return s - lse

    logp_row = log_softmax(logits, axis=1)
    logp_col = log_softmax(logits, axis=0)

    row_loss = (-jnp.sum(tgt * logp_row, axis=1, keepdims=True)
                / jnp.sum(tgt, axis=1, keepdims=True))         # (N, 1), den >= 1
    col_loss = (-jnp.sum(tgt * logp_col, axis=0, keepdims=True)
                / jnp.sum(tgt, axis=0, keepdims=True))         # (1, N)

    total = (jnp.sum(row_loss, axis=0, keepdims=True)
             + jnp.sum(col_loss, axis=1, keepdims=True))        # (1, 1)
    out_ref[...] = total * (0.5 / float(n))


def unicl_loss(text_features, image_features, labels, logit_scale=2.659):
    n, d = text_features.shape
    lab_row = labels.reshape(1, n).astype(jnp.int32)

    kernel = functools.partial(_unicl_kernel, logit_scale=float(logit_scale))
    out = pl.pallas_call(
        kernel,
        out_shape=jax.ShapeDtypeStruct((1, 1), jnp.float32),
        in_specs=[
            pl.BlockSpec((n, d), lambda: (0, 0)),   # text_features
            pl.BlockSpec((n, d), lambda: (0, 0)),   # image_features
            pl.BlockSpec((1, n), lambda: (0, 0)),   # labels (row)
        ],
        out_specs=pl.BlockSpec((1, 1), lambda: (0, 0)),
    )(text_features, image_features, lab_row)
    return out[0, 0]


def unicl_loss_reference(text_features, image_features, labels,
                         logit_scale=2.659):
    """Pure-JAX reference mirroring the PyTorch semantics."""
    def norm(x):
        return x / jnp.maximum(
            jnp.linalg.norm(x, axis=-1, keepdims=True), 1e-12)

    img_n = norm(image_features)
    txt_n = norm(text_features)
    li = logit_scale * img_n @ txt_n.T
    lt = logit_scale * txt_n @ img_n.T
    n = li.shape[0]
    eye = jnp.eye(n, dtype=jnp.float32)
    same = ((labels[:, None] == labels[None, :])
            & (labels[:, None] != -1) & (labels[None, :] != -1))
    tgt = jnp.maximum(eye, same.astype(jnp.float32))

    def soft_ce(s, t):
        logp = jax.nn.log_softmax(s, axis=-1)
        return jnp.mean(-(t * logp).sum(-1) / t.sum(-1))

    return 0.5 * (soft_ce(li, tgt) + soft_ce(lt, tgt))


if __name__ == "__main__":
    N, D = 8, 32  # batch of image/text pairs = 8, hidden = 32
    key = jax.random.PRNGKey(0)
    k1, k2 = jax.random.split(key)
    text_features = jax.random.normal(k1, (N, D), dtype=jnp.float32)
    image_features = jax.random.normal(k2, (N, D), dtype=jnp.float32)
    # labels: duplicates (shared positives) and -1 (unlabeled / eye-only rows)
    labels = jnp.array([0, 1, 0, -1, 2, 1, -1, 3], dtype=jnp.int32)

    loss = unicl_loss(text_features, image_features, labels)
    loss = jax.block_until_ready(loss)

    ref = unicl_loss_reference(text_features, image_features, labels)
    ref = jax.block_until_ready(ref)
    assert jnp.allclose(loss, ref, rtol=1e-5, atol=1e-5), (loss, ref)

    print("KERNEL_OK")
</pallas_src>

<mosaic_0001>
module attributes {stable_mosaic.version = 11 : i64} {
  func.func @_unicl_kernel(%arg0: memref<8x32xf32, #tpu.memory_space<vmem>>, %arg1: memref<8x32xf32, #tpu.memory_space<vmem>>, %arg2: memref<1x8xi32, #tpu.memory_space<vmem>>, %arg3: memref<1x1xf32, #tpu.memory_space<vmem>>) attributes {dimension_semantics = [], scalar_prefetch = 0 : i64, scratch_operands = 0 : i64, tpu.core_type = #tpu.core_type<tc>} {
    %c0 = arith.constant 0 : index
    %c0_0 = arith.constant 0 : index
    %0 = vector.load %arg0[%c0, %c0_0] : memref<8x32xf32, #tpu.memory_space<vmem>>, vector<8x32xf32>
    %c0_1 = arith.constant 0 : index
    %c0_2 = arith.constant 0 : index
    %1 = vector.load %arg1[%c0_1, %c0_2] : memref<8x32xf32, #tpu.memory_space<vmem>>, vector<8x32xf32>
    %2 = arith.mulf %1, %1 : vector<8x32xf32>
    %cst = arith.constant dense<0.000000e+00> : vector<8xf32>
    %3 = vector.multi_reduction <add>, %2, %cst [1] : vector<8x32xf32> to vector<8xf32>
    %4 = vector.shape_cast %3 : vector<8xf32> to vector<8x1xf32>
    %cst_3 = arith.constant 1.000000e-24 : f32
    %5 = vector.broadcast %cst_3 : f32 to vector<8x1xf32>
    %6 = arith.maximumf %4, %5 : vector<8x1xf32>
    %7 = math.rsqrt %6 : vector<8x1xf32>
    %cst_4 = arith.constant 2.659000e+00 : f32
    %8 = vector.broadcast %cst_4 : f32 to vector<8x1xf32>
    %9 = arith.mulf %7, %8 : vector<8x1xf32>
    %10 = vector.broadcast %9 : vector<8x1xf32> to vector<8x32xf32>
    %11 = arith.mulf %1, %10 : vector<8x32xf32>
    %12 = arith.mulf %0, %0 : vector<8x32xf32>
    %cst_5 = arith.constant dense<0.000000e+00> : vector<8xf32>
    %13 = vector.multi_reduction <add>, %12, %cst_5 [1] : vector<8x32xf32> to vector<8xf32>
    %14 = vector.shape_cast %13 : vector<8xf32> to vector<8x1xf32>
    %cst_6 = arith.constant 1.000000e-24 : f32
    %15 = vector.broadcast %cst_6 : f32 to vector<8x1xf32>
    %16 = arith.maximumf %14, %15 : vector<8x1xf32>
    %17 = math.rsqrt %16 : vector<8x1xf32>
    %18 = vector.broadcast %17 : vector<8x1xf32> to vector<8x32xf32>
    %19 = arith.mulf %0, %18 : vector<8x32xf32>
    %cst_7 = arith.constant dense<0.000000e+00> : vector<8x8xf32>
    %20 = tpu.matmul %11, %19, %cst_7 {dimension_numbers = #tpu.dot_dimension_numbers<[1], [1], [0], [0], [0, 0, 1, 0], [], []>} : vector<8x32xf32>, vector<8x32xf32>, vector<8x8xf32> -> vector<8x8xf32>
    %c0_8 = arith.constant 0 : index
    %c0_9 = arith.constant 0 : index
    %21 = vector.load %arg2[%c0_8, %c0_9] : memref<1x8xi32, #tpu.memory_space<vmem>>, vector<1x8xi32>
    %22 = tpu.transpose %21, [1, 0] : vector<1x8xi32> -> vector<8x1xi32>
    %23 = vector.shape_cast %21 : vector<1x8xi32> to vector<1x8xi32>
    %24 = vector.broadcast %23 : vector<1x8xi32> to vector<8x8xi32>
    %25 = vector.shape_cast %22 : vector<8x1xi32> to vector<8x1xi32>
    %26 = vector.broadcast %25 : vector<8x1xi32> to vector<8x8xi32>
    %27 = tpu.iota {dimensions = array<i32: 0>} : vector<8x8xi32>
    %28 = tpu.iota {dimensions = array<i32: 1>} : vector<8x8xi32>
    %29 = arith.cmpi eq, %27, %28 : vector<8x8xi32>
    %30 = arith.cmpi eq, %26, %24 : vector<8x8xi32>
    %c-1_i32 = arith.constant -1 : i32
    %31 = vector.broadcast %c-1_i32 : i32 to vector<8x8xi32>
    %32 = arith.cmpi ne, %26, %31 : vector<8x8xi32>
    %33 = arith.andi %30, %32 : vector<8x8xi1>
    %c-1_i32_10 = arith.constant -1 : i32
    %34 = vector.broadcast %c-1_i32_10 : i32 to vector<8x8xi32>
    %35 = arith.cmpi ne, %24, %34 : vector<8x8xi32>
    %36 = arith.andi %33, %35 : vector<8x8xi1>
    %37 = arith.ori %29, %36 : vector<8x8xi1>
    %cst_11 = arith.constant 1.000000e+00 : f32
    %cst_12 = arith.constant 0.000000e+00 : f32
    %38 = vector.broadcast %cst_11 : f32 to vector<8x8xf32>
    %39 = vector.broadcast %cst_12 : f32 to vector<8x8xf32>
    %40 = arith.select %37, %38, %39 : vector<8x8xi1>, vector<8x8xf32>
    %cst_13 = arith.constant dense<0xFF800000> : vector<8xf32>
    %41 = vector.multi_reduction <maximumf>, %20, %cst_13 [1] : vector<8x8xf32> to vector<8xf32>
    %42 = vector.shape_cast %41 : vector<8xf32> to vector<8x1xf32>
    %43 = vector.broadcast %42 : vector<8x1xf32> to vector<8x8xf32>
    %44 = arith.subf %20, %43 : vector<8x8xf32>
    %45 = math.exp %44 : vector<8x8xf32>
    %cst_14 = arith.constant dense<0.000000e+00> : vector<8xf32>
    %46 = vector.multi_reduction <add>, %45, %cst_14 [1] : vector<8x8xf32> to vector<8xf32>
    %47 = vector.shape_cast %46 : vector<8xf32> to vector<8x1xf32>
    %48 = math.log %47 : vector<8x1xf32>
    %49 = arith.addf %42, %48 : vector<8x1xf32>
    %50 = vector.broadcast %49 : vector<8x1xf32> to vector<8x8xf32>
    %51 = arith.subf %20, %50 : vector<8x8xf32>
    %cst_15 = arith.constant dense<0xFF800000> : vector<8xf32>
    %52 = vector.multi_reduction <maximumf>, %20, %cst_15 [0] : vector<8x8xf32> to vector<8xf32>
    %53 = vector.shape_cast %52 : vector<8xf32> to vector<1x8xf32>
    %54 = vector.broadcast %53 : vector<1x8xf32> to vector<8x8xf32>
    %55 = arith.subf %20, %54 : vector<8x8xf32>
    %56 = math.exp %55 : vector<8x8xf32>
    %cst_16 = arith.constant dense<0.000000e+00> : vector<8xf32>
    %57 = vector.multi_reduction <add>, %56, %cst_16 [0] : vector<8x8xf32> to vector<8xf32>
    %58 = vector.shape_cast %57 : vector<8xf32> to vector<1x8xf32>
    %59 = math.log %58 : vector<1x8xf32>
    %60 = arith.addf %53, %59 : vector<1x8xf32>
    %61 = vector.broadcast %60 : vector<1x8xf32> to vector<8x8xf32>
    %62 = arith.subf %20, %61 : vector<8x8xf32>
    %63 = arith.mulf %40, %51 : vector<8x8xf32>
    %cst_17 = arith.constant dense<0.000000e+00> : vector<8xf32>
    %64 = vector.multi_reduction <add>, %63, %cst_17 [1] : vector<8x8xf32> to vector<8xf32>
    %65 = vector.shape_cast %64 : vector<8xf32> to vector<8x1xf32>
    %cst_18 = arith.constant 0.000000e+00 : f32
    %66 = vector.broadcast %cst_18 : f32 to vector<8x1xf32>
    %67 = arith.subf %66, %65 : vector<8x1xf32>
    %cst_19 = arith.constant dense<0.000000e+00> : vector<8xf32>
    %68 = vector.multi_reduction <add>, %40, %cst_19 [1] : vector<8x8xf32> to vector<8xf32>
    %69 = vector.shape_cast %68 : vector<8xf32> to vector<8x1xf32>
    %70 = arith.divf %67, %69 : vector<8x1xf32>
    %71 = arith.mulf %40, %62 : vector<8x8xf32>
    %cst_20 = arith.constant dense<0.000000e+00> : vector<8xf32>
    %72 = vector.multi_reduction <add>, %71, %cst_20 [0] : vector<8x8xf32> to vector<8xf32>
    %73 = vector.shape_cast %72 : vector<8xf32> to vector<1x8xf32>
    %cst_21 = arith.constant 0.000000e+00 : f32
    %74 = vector.broadcast %cst_21 : f32 to vector<1x8xf32>
    %75 = arith.subf %74, %73 : vector<1x8xf32>
    %cst_22 = arith.constant dense<0.000000e+00> : vector<8xf32>
    %76 = vector.multi_reduction <add>, %40, %cst_22 [0] : vector<8x8xf32> to vector<8xf32>
    %77 = vector.shape_cast %76 : vector<8xf32> to vector<1x8xf32>
    %78 = arith.divf %75, %77 : vector<1x8xf32>
    %cst_23 = arith.constant dense<0.000000e+00> : vector<1xf32>
    %79 = vector.multi_reduction <add>, %70, %cst_23 [0] : vector<8x1xf32> to vector<1xf32>
    %80 = vector.shape_cast %79 : vector<1xf32> to vector<1x1xf32>
    %cst_24 = arith.constant dense<0.000000e+00> : vector<1xf32>
    %81 = vector.multi_reduction <add>, %78, %cst_24 [1] : vector<1x8xf32> to vector<1xf32>
    %82 = vector.shape_cast %81 : vector<1xf32> to vector<1x1xf32>
    %83 = arith.addf %80, %82 : vector<1x1xf32>
    %cst_25 = arith.constant 6.250000e-02 : f32
    %84 = vector.broadcast %cst_25 : f32 to vector<1x1xf32>
    %85 = arith.mulf %83, %84 : vector<1x1xf32>
    %c0_26 = arith.constant 0 : index
    %c0_27 = arith.constant 0 : index
    %86 = vector.load %arg3[%c0_26, %c0_27] : memref<1x1xf32, #tpu.memory_space<vmem>>, vector<1x1xf32>
    tpu.vector_store %arg3[%c0_26, %c0_27], %85 {strides = array<i32>} : memref<1x1xf32, #tpu.memory_space<vmem>>, vector<1x1xf32>,
    return
  }
}

</mosaic_0001>

<bundles_post_ra>
// kernel: tpu_custom_call.1
= control target key start
LH: loop header
LB: loop body
LE: loop exit
PB: predicated region body
PF: predicated region fallthrough
CT: control target
= control target key end

     0   :  { %8 = vsyncpa [#allocation3], 0  ;;  %s432_s0 = inlined_call_operand.hbm [shape: f32[8,32], index: 0, kind: input, shape index: {}]   ;;  %s433_s1 = inlined_call_operand.hbm [shape: f32[8,32], index: 1, kind: input, shape index: {}]   ;;  %s434_s2 = inlined_call_operand.vmem [shape: s32[1,8], index: 2, kind: input, shape index: {}]   ;;  %s435_s3 = inlined_call_operand.hbm [shape: f32[1,1], index: 3, kind: output, shape index: {}]  }
   0x1   :  { %9 = vsyncpa [#allocation6], 0 }
   0x2   :  { %10 = vsyncpa [#allocation4], 0  ;;  %s373_s12 = smov [#allocation2]   ;;  %s374_s14 = smov [#allocation5]  }
   0x3   :  { %s17_s13 = sshll.u32 %s373_s12, 4  ;;  %s27_s15 = sshll.u32 %s374_s14, 4  ;;  %s18_s13 = int_to_ptr.vmem [resolvable:$true] %s17_s13  ;;  %s28_s15 = int_to_ptr.vmem [resolvable:$true] %s27_s15 }
   0x4   :  { %s315_s16 = scalar_lea.vmem %s18_s13, 128  ;;  %p320_p1 = scmp.lt.s32.totalorder %s18_s13, %s18_s13 }
   0x5   :  { %p316_p0 = scmp.ne.s32.totalorder %s18_s13, %s315_s16  ;;  %p321_p2 = scmp.lt.s32.totalorder %s315_s16, %s315_s16 }
   0x7   :  { %p322_p3 = por %p321_p2, %p320_p1 }
   0x9   :  { %p323_p4 = pnand %p322_p3, %p316_p0 }
   0xb   :  { %326 = shalt.err (!%p323_p4)
}
   0xc   :  { %20 = dma.hbm_to_vmem [thread:$0]  %s432_s0, 128, %s18_s13, [#allocation3]  }
   0xd   :  { %s335_s19 = scalar_lea.vmem %s28_s15, 128  ;;  %p340_p6 = scmp.lt.s32.totalorder %s28_s15, %s28_s15 }
   0xe   :  { %p336_p5 = scmp.ne.s32.totalorder %s28_s15, %s335_s19  ;;  %p341_p7 = scmp.lt.s32.totalorder %s335_s19, %s335_s19 }
  0x10   :  { %p342_p8 = por %p341_p7, %p340_p6 }
  0x12   :  { %p343_p9 = pnand %p342_p8, %p336_p5 }
  0x14   :  { %346 = shalt.err (!%p343_p9)
}
  0x15   :  { %30 = dma.hbm_to_vmem [thread:$0]  %s433_s1, 128, %s28_s15, [#allocation6]  }
  0x16   :  { %367 = dma.done.wait [#allocation3], 128  }
  0x17   :  { %368 = vsyncadd [#allocation3], 4294967168 }
  0x18   :  { %369 = dma.done.wait [#allocation6], 128  }
  0x19   :  { %370 = vsyncadd [#allocation6], 4294967168  ;;  %v39_v0 = vld [vmem:[#allocation2] sm:$0xff]  ;;  %vm42_vm0 = vcmask 261120   ;;  %v40_v1 = vld [vmem:[#allocation5] sm:$0xff]  ;;  %v375_v6 = vmov 0.0   ;;  %v166_v43 = vlaneseq }
  0x1a   :  { %v50_v2 = vmul.f32 %v39_v0, %v39_v0  ;;  %v41_v3 = vmul.f32 %v40_v1, %v40_v1  ;;  %279 = vmatprep.subr.mxu0 %v375_v6  ;;  %vm376_vm1 = vmmov 0   ;;  %vm185_vm2 = vcmask 64512   ;;  %v133_v20 = vld [vmem:[%s434_s2] sm:$0x1]  ;;  %s378_s2 = smov [#allocation7]  }
  0x1b   :  { %281 = vmatprep.mubr.msk.f32.mxu0 %vm376_vm1, %v375_v6  ;;  %v377_v19 = vmov 0   ;;  %v167_v44 = vshrl.u32 %v166_v43, 7  ;;  %v176_v50 = vand.u32 127, %v166_v43  ;;  %s265_s22 = sshll.u32 %s378_s2, 4  ;;  %vm257_vm10 = vcmask 0   ;;  %s266_s22 = int_to_ptr.vmem [resolvable:$true] %s265_s22 }
  0x1c   :  { %v51_v4 = vsel %vm42_vm0, %v50_v2, 0.0  ;;  %v43_v5 = vsel %vm42_vm0, %v41_v3, 0.0  ;;  %290 = vset.pattern.permute.xlu0 %v377_v19  ;;  %s347_s23 = scalar_lea.vmem %s266_s22, 16  ;;  %s351_s24 = scalar_lea.vmem %s266_s22, 32 }
  0x1d   :  { %52 = vadd.xlane.f32.xlu0 %v51_v4  ;;  %v168_v45 = vsub.s32 0, %v167_v44  ;;  %vm177_vm4 = vcmp.eq.s32.totalorder %v167_v44, %v176_v50  ;;  %p348_p10 = scmp.ne.s32.totalorder %s266_s22, %s347_s23  ;;  %p352_p11 = scmp.lt.s32.totalorder %s266_s22, %s266_s22 }
  0x1e   :  { %p353_p12 = scmp.lt.s32.totalorder %s351_s24, %s347_s23 }
  0x1f   :  { %v169_v49 = vrot.slane %v133_v20, %v168_v45 }
  0x20   :  { %p354_p13 = por %p353_p12, %p352_p11 }
  0x21   :  { %44 = vadd.xlane.f32.xlu0 %v43_v5  ;;  %vm181_vm3 = vcmp.ne.s32.totalorder %v169_v49, 4294967295 }
  0x22   :  { %p355_p0 = pnand %p354_p13, %p348_p10 }
  0xa6   :  { %v53_v7 = vpop.xlane.xlu0 %52 }
  0xa7   :  { %v54_v8 = vmax.f32 %v53_v7, 1e-24 }
  0xa9   :  { %291 = vrsqrt.f32 %v54_v8 }
  0xaa   :  { %v45_v9 = vpop.xlane.xlu0 %44 }
  0xab   :  { %v46_v10 = vmax.f32 %v45_v9, 1e-24 }
  0xad   :  { %293 = vrsqrt.f32 %v46_v10 }
  0xb6   :  { %v292_v11 = vpop.eup %291 }
  0xb7   :  { %v56_v12 = vmul.f32 %v292_v11, %v39_v0 }
  0xb9   :  { %280 = vmatpush3.xpose.msk.msra.mxu0 %vm42_vm0, %v56_v12 }
  0xba   :  { %v294_v13 = vpop.eup %293 }
  0xbb   :  { %v48_v14 = vmul.f32 2.659, %v294_v13 }
  0xbd   :  { %v49_v15 = vmul.f32 %v48_v14, %v40_v1 }
  0xbf   :  { %282 = vmatmul.mubr.msk.f32.vlgmr.msra.gmra.mxu0 %vm42_vm0, %v49_v15 }
 0x17f   :  { %v411_v16 = vpop.f32.mrf.mxu0 }
 0x180   :  { %v186_v17 = vsel %vm185_vm2, %v411_v16, -inf }
 0x181   :  { %187 = vmax.xlane.f32.xlu1 %v186_v17  ;;  %v283_v18 = vpop.f32.mrf.mxu0  ;;  %v199_v27 = vrot.slane %v186_v17, 4 }
 0x183   :  { %v200_v28 = vmax.f32 %v186_v17, %v199_v27 }
 0x185   :  { %v201_v29 = vrot.slane %v200_v28, 2 }
 0x187   :  { %v202_v30 = vmax.f32 %v200_v28, %v201_v29 }
 0x189   :  { %v203_v31 = vrot.slane %v202_v30, 1 }
 0x18b   :  { %v204_v32 = vmax.f32 %v202_v30, %v203_v31 }
 0x18d   :  { %v205_v33 = vsub.f32 %v411_v16, %v204_v32 }
 0x18f   :  { %v206_v34 = vmul.f32 1.442695, %v205_v33 }
 0x1b4   :  { %134 = vxpose.xlu1.b32.start.end [1/1] (short) (narrow) %v133_v20, 8 }
 0x20a   :  { %v188_v21 = vpop.xlane.xlu1 %187 }
 0x20b   :  { %v189_v22 = vsub.f32 %v411_v16, %v188_v21 }
 0x20d   :  { %v190_v23 = vmul.f32 1.442695, %v189_v22 }
 0x20f   :  { %295 = vpow2.f32 %v190_v23 }
 0x210   :  { %297 = vpow2.f32 %v206_v34 }
 0x21c   :  { %v296_v24 = vpop.eup %295 }
 0x21d   :  { %v192_v25 = vsel %vm185_vm2, %v296_v24, 0.0  ;;  %v298_v35 = vpop.eup %297 }
 0x21e   :  { %193 = vadd.xlane.f32.xlu0 %v192_v25  ;;  %v208_v36 = vsel %vm185_vm2, %v298_v35, 0.0 }
 0x21f   :  { %v209_v37 = vrot.slane %v208_v36, 4 }
 0x221   :  { %v210_v38 = vadd.f32 %v209_v37, %v208_v36 }
 0x223   :  { %v211_v39 = vrot.slane %v210_v38, 2 }
 0x225   :  { %v212_v40 = vadd.f32 %v211_v39, %v210_v38 }
 0x227   :  { %v213_v41 = vrot.slane %v212_v40, 1 }
 0x229   :  { %v214_v42 = vadd.f32 %v213_v41, %v212_v40 }
 0x22b   :  { %299 = vlog2.f32 %v214_v42 }
 0x230   :  { %v150_v26 = vpop.trf.xlu1 }
 0x234   :  { %171 = vperm.xlu0 %290, %v150_v26  }
 0x238   :  { %v300_v47 = vpop.eup %299 }
 0x239   :  { %v216_v48 = vmul.f32 0.6931472, %v300_v47 }
 0x23b   :  { %v217_v51 = vadd.f32 %v216_v48, %v204_v32 }
 0x23d   :  { %v218_v53 = vsub.f32 %v411_v16, %v217_v51 }
 0x2a7   :  { %v194_v46 = vpop.xlane.xlu0 %193 }
 0x2a8   :  { %301 = vlog2.f32 %v194_v46 }
 0x2af   :  { %v172_v52 = vpop.permute.xlu0 %171 }
 0x2b0   :  { %vm178_vm5 = vcmp.eq.s32.totalorder %v172_v52, %v169_v49  ;;  %vm179_vm6 = vcmp.ne.s32.totalorder %v172_v52, 4294967295 }
 0x2b1   :  { %vm180_vm7 = vmand %vm178_vm5, %vm179_vm6 }
 0x2b2   :  { %vm182_vm8 = vmand %vm180_vm7, %vm181_vm3 }
 0x2b3   :  { %vm183_vm9 = vmor %vm177_vm4, %vm182_vm8 }
 0x2b4   :  { %v184_v54 = vsel %vm183_vm9, 1.0, %v375_v6 }
 0x2b5   :  { %v302_v55 = vpop.eup %301  ;;  %v224_v56 = vsel %vm185_vm2, %v184_v54, 0.0  ;;  %v229_v57 = vmul.f32 %v218_v53, %v184_v54 }
 0x2b6   :  { %v196_v58 = vmul.f32 0.6931472, %v302_v55  ;;  %225 = vadd.xlane.f32.xlu1 %v224_v56  ;;  %v238_v59 = vrot.slane %v224_v56, 4 }
 0x2b7   :  { %v230_v60 = vsel %vm185_vm2, %v229_v57, 0.0 }
 0x2b8   :  { %v197_v61 = vadd.f32 %v196_v58, %v188_v21  ;;  %v231_v62 = vrot.slane %v230_v60, 4  ;;  %v239_v63 = vadd.f32 %v238_v59, %v224_v56 }
 0x2ba   :  { %v240_v0 = vrot.slane %v239_v63, 2  ;;  %v198_v1 = vsub.f32 %v411_v16, %v197_v61  ;;  %v232_v2 = vadd.f32 %v231_v62, %v230_v60 }
 0x2bc   :  { %v241_v3 = vadd.f32 %v240_v0, %v239_v63  ;;  %v219_v4 = vmul.f32 %v198_v1, %v184_v54  ;;  %v233_v7 = vrot.slane %v232_v2, 2 }
 0x2be   :  { %v242_v5 = vrot.slane %v241_v3, 1  ;;  %v220_v6 = vsel %vm185_vm2, %v219_v4, 0.0  ;;  %v234_v9 = vadd.f32 %v233_v7, %v232_v2 }
 0x2bf   :  { %221 = vadd.xlane.f32.xlu0 %v220_v6 }
 0x2c0   :  { %v243_v8 = vadd.f32 %v242_v5, %v241_v3  ;;  %v235_v10 = vrot.slane %v234_v9, 1 }
 0x2c2   :  { %303 = vrcp.f32 %v243_v8  ;;  %v236_v11 = vadd.f32 %v235_v10, %v234_v9 }
 0x2c4   :  { %v237_v12 = vsub.f32 0.0, %v236_v11 }
 0x2cf   :  { %v304_v13 = vpop.eup %303 }
 0x2d0   :  { %v245_v14 = vmul.f32 %v304_v13, %v237_v12 }
 0x2d2   :  { %v252_v15 = vsel %vm185_vm2, %v245_v14, 0.0 }
 0x2d3   :  { %253 = vadd.xlane.f32.xlu0 %v252_v15 }
 0x33f   :  { %v226_v16 = vpop.xlane.xlu1 %225 }
 0x340   :  { %305 = vrcp.f32 %v226_v16 }
 0x348   :  { %v222_v17 = vpop.xlane.xlu0 %221 }
 0x349   :  { %v223_v18 = vsub.f32 0.0, %v222_v17 }
 0x34d   :  { %v306_v19 = vpop.eup %305 }
 0x34e   :  { %v228_v20 = vmul.f32 %v306_v19, %v223_v18 }
 0x350   :  { %v246_v21 = vrot.slane %v228_v20, 4 }
 0x352   :  { %v247_v22 = vadd.f32 %v246_v21, %v228_v20 }
 0x354   :  { %v248_v23 = vrot.slane %v247_v22, 2 }
 0x356   :  { %v249_v24 = vadd.f32 %v248_v23, %v247_v22 }
 0x358   :  { %v250_v25 = vrot.slane %v249_v24, 1 }
 0x35a   :  { %v251_v26 = vadd.f32 %v250_v25, %v249_v24 }
 0x35c   :  { %v254_v27 = vpop.xlane.xlu0 %253 }
 0x35d   :  { %v255_v28 = vadd.f32 %v254_v27, %v251_v26 }
 0x35f   :  { %v256_v29 = vmul.f32 0.0625, %v255_v28 }
 0x361   :  { %258 = vst.msk [vmem:[#allocation7] sm:$0x1] %vm257_vm10, %v256_v29 }
 0x362   :  { %358 = shalt.err (!%p355_p0)
}
 0x363   :  { %268 = dma.vmem_to_hbm [thread:$0]  %s266_s22, 16, %s435_s3, [#allocation4]  }
 0x364   :  { %371 = dma.done.wait [#allocation4], 16  }
 0x365   :  { %372 = vsyncadd [#allocation4], 4294967280 }
 0x366   :  { %272 = vsyncpa [#allocation3], 1 }
 0x367   :  { %273 = vsyncpa [#allocation6], 1 }
 0x368   :  { %274 = vsyncpa [#allocation4], 1 }

</bundles_post_ra>
